<compile_context>
chip_gen: v7x
topology: tpu7x:2x2x1
jax: 0.10.0
libtpu: 0.0.40
codegen_flags: <defaults>
</compile_context>

<pallas_src>
import functools

import jax
import jax.numpy as jnp
from jax.experimental import pallas as pl
from jax.experimental.pallas import tpu as pltpu


def _round_up(x, m):
    return ((x + m - 1) // m) * m


_VMEM_LIMIT = 56 * 1024 * 1024       # > default scoped limit, < v7x 64 MiB physical
_RESIDENT_BUDGET = 44 * 1024 * 1024  # conservative: assumes double-buffered weight


# ---------------------------------------------------------------------------
# Path A: weight fully VMEM-resident (typical transformer D).
# 1-D grid over row tiles; one MXU dot over the full K per tile; bias and the
# full-precision residual are fused into the same kernel.
# ---------------------------------------------------------------------------
def _residual_resident_kernel(x_ref, w_ref, b_ref, o_ref):
    x = x_ref[...]                                            # (tm, Dp), x.dtype
    y = jnp.dot(x.astype(w_ref.dtype), w_ref[...],            # bf16 MXU feeds
                preferred_element_type=jnp.float32)           # f32 accumulation
    y = y + b_ref[...] + x.astype(jnp.float32)                # bias + f32 residual
    o_ref[...] = y.astype(o_ref.dtype)


# ---------------------------------------------------------------------------
# Path B: K-tiled fallback for very large D.  Grid (i, j, k); tn == tk, so the
# matmul x tile at k == j is exactly the residual tile for output block (i, j)
# -> no separate residual input.  Bias is folded into the accumulator init.
# ---------------------------------------------------------------------------
def _residual_ktiled_kernel(x_ref, w_ref, b_ref, o_ref, acc_ref):
    j = pl.program_id(1)
    k = pl.program_id(2)
    x = x_ref[...]                                            # (tm, tk), x.dtype

    @pl.when(k == 0)
    def _():
        acc_ref[...] = jnp.broadcast_to(b_ref[...], acc_ref.shape)

    acc_ref[...] += jnp.dot(x.astype(w_ref.dtype), w_ref[...],
                            preferred_element_type=jnp.float32)

    @pl.when(k == j)                                          # residual fold
    def _():
        acc_ref[...] += x.astype(jnp.float32)

    @pl.when(k == pl.num_programs(2) - 1)
    def _():
        o_ref[...] = acc_ref[...].astype(o_ref.dtype)


@functools.partial(jax.jit, static_argnames=("tm", "force_ktiled"))
def residual(x, w, b, *, tm=512, force_ktiled=False):
    """out = x @ w + b + x   (Residual around a dim->dim Linear).

    x: (..., D), w: (D, D), b: (D,).  The matmul uses bf16 MXU feeds with f32
    accumulation (intentional); the residual add uses x at full precision.
    """
    *lead, D = x.shape
    M = 1
    for s in lead:
        M *= s
    out_dtype = x.dtype

    x2 = x.reshape(M, D)

    # Lane-dense feature dim: pad only when D is not already a 128 multiple
    # (required so the K reduction never reads garbage).
    Dp = _round_up(D, 128)
    if Dp != D:
        x2 = jnp.pad(x2, ((0, 0), (0, Dp - D)))
        w = jnp.pad(w, ((0, Dp - D), (0, Dp - D)))
        b = jnp.pad(b, (0, Dp - D))

    # Rows: pad only to a multiple of 8; ragged last row tile handled by the
    # cdiv grid (out-of-range writes are clipped, garbage overhang rows never
    # contaminate valid rows since the matmul is row-independent).
    Mp = _round_up(M, 8)
    if Mp != M:
        x2 = jnp.pad(x2, ((0, Mp - M), (0, 0)))

    w2 = w.astype(jnp.bfloat16)                 # bf16 weight (halves HBM traffic)
    b2 = b.astype(jnp.float32).reshape(1, Dp)

    x_bytes = x2.dtype.itemsize
    o_bytes = jnp.dtype(out_dtype).itemsize

    # ---- pick the resident-weight path if it fits the VMEM budget ----------
    tm_res = None
    if not force_ktiled:
        w_vmem = 2 * Dp * Dp * 2                # bf16 weight, assume double-buffered
        for cand in (512, 256, 128, 64, 32, 16, 8):
            if cand > Mp:
                continue
            est = w_vmem + 2 * cand * Dp * (x_bytes + o_bytes) + 8 * Dp
            if est <= _RESIDENT_BUDGET:
                tm_res = min(cand, tm)
                break

    if tm_res is not None:
        # ------------------------ Path A: resident weight -------------------
        tm_eff = tm_res
        cost = pl.CostEstimate(
            flops=2 * Mp * Dp * Dp,
            transcendentals=0,
            bytes_accessed=(Mp * Dp * x_bytes       # x read once
                            + Dp * Dp * 2           # weight read once
                            + Dp * 4                 # bias
                            + Mp * Dp * o_bytes),    # output
        )
        out2 = pl.pallas_call(
            _residual_resident_kernel,
            out_shape=jax.ShapeDtypeStruct((Mp, Dp), out_dtype),
            grid_spec=pltpu.PrefetchScalarGridSpec(
                num_scalar_prefetch=0,
                grid=(pl.cdiv(Mp, tm_eff),),
                in_specs=[
                    pl.BlockSpec((tm_eff, Dp), lambda i: (i, 0)),  # x row tile
                    pl.BlockSpec((Dp, Dp), lambda i: (0, 0)),      # resident weight
                    pl.BlockSpec((1, Dp), lambda i: (0, 0)),       # resident bias
                ],
                out_specs=pl.BlockSpec((tm_eff, Dp), lambda i: (i, 0)),
            ),
            compiler_params=pltpu.CompilerParams(
                dimension_semantics=("parallel",),
                vmem_limit_bytes=_VMEM_LIMIT,
            ),
            cost_estimate=cost,
        )(x2, w2, b2)
    else:
        # ------------------------ Path B: K-tiled ----------------------------
        tn = tk = 512 if Dp % 512 == 0 else (256 if Dp % 256 == 0 else 128)
        tm_eff = min(tm, Mp)
        tm_eff = max(8, (tm_eff // 8) * 8)
        n_row_tiles = pl.cdiv(Mp, tm_eff)
        cost = pl.CostEstimate(
            flops=2 * Mp * Dp * Dp,
            transcendentals=0,
            bytes_accessed=((Dp // tn) * Mp * Dp * x_bytes   # x re-read per j slab
                            + n_row_tiles * Dp * Dp * 2      # weight re-read per row tile
                            + (Dp // tn) * Dp * 4            # bias
                            + Mp * Dp * o_bytes),            # output
        )
        out2 = pl.pallas_call(
            _residual_ktiled_kernel,
            out_shape=jax.ShapeDtypeStruct((Mp, Dp), out_dtype),
            grid_spec=pltpu.PrefetchScalarGridSpec(
                num_scalar_prefetch=0,
                grid=(n_row_tiles, Dp // tn, Dp // tk),
                in_specs=[
                    pl.BlockSpec((tm_eff, tk), lambda i, j, k: (i, k)),  # x (matmul+residual)
                    pl.BlockSpec((tk, tn), lambda i, j, k: (k, j)),      # weight slab
                    pl.BlockSpec((1, tn), lambda i, j, k: (0, j)),       # bias slab
                ],
                out_specs=pl.BlockSpec((tm_eff, tn), lambda i, j, k: (i, j)),
                scratch_shapes=[pltpu.VMEM((tm_eff, tn), jnp.float32)],
            ),
            compiler_params=pltpu.CompilerParams(
                dimension_semantics=("parallel", "parallel", "arbitrary"),
                vmem_limit_bytes=_VMEM_LIMIT,
            ),
            cost_estimate=cost,
        )(x2, w2, b2)

    return out2[:M, :D].reshape(*lead, D)


if __name__ == "__main__":
    # small transformer-ish shapes; D=128 keeps the lane axis dense
    B, S, D = 2, 8, 128

    key = jax.random.PRNGKey(0)
    kx, kw, kb = jax.random.split(key, 3)
    x = jax.random.normal(kx, (B, S, D), dtype=jnp.float32)
    w = jax.random.normal(kw, (D, D), dtype=jnp.float32) / jnp.sqrt(D)
    b = jax.random.normal(kb, (D,), dtype=jnp.float32) * 0.01

    out = residual(x, w, b)                        # resident-weight path
    jax.block_until_ready(out)

    out_kt = residual(x, w, b, force_ktiled=True)  # K-tiled fallback path
    jax.block_until_ready(out_kt)

    # Reference for Residual semantics: fn(x) + x with fn = Linear.
    # The kernel feeds bf16 operands to the MXU (f32 accumulation) but keeps
    # the residual add at full precision, so the reference mirrors that.
    xb = x.astype(jnp.bfloat16).astype(jnp.float32)
    wb = w.astype(jnp.bfloat16).astype(jnp.float32)
    ref = (xb.reshape(-1, D) @ wb + b).reshape(B, S, D) + x

    assert jnp.allclose(out, ref, atol=2e-2, rtol=2e-2), "resident path mismatch"
    assert jnp.allclose(out_kt, ref, atol=2e-2, rtol=2e-2), "k-tiled path mismatch"

    print("KERNEL_OK")
</pallas_src>

<mosaic_0001>
module attributes {stable_mosaic.version = 11 : i64} {
  func.func @_residual_resident_kernel(%arg0: i32, %arg1: memref<16x128xf32, #tpu.memory_space<vmem>>, %arg2: memref<128x128xbf16, #tpu.memory_space<vmem>>, %arg3: memref<1x128xf32, #tpu.memory_space<vmem>>, %arg4: memref<16x128xf32, #tpu.memory_space<vmem>>) attributes {dimension_semantics = [#tpu.dimension_semantics<parallel>], iteration_bounds = array<i64: 1>, scalar_prefetch = 0 : i64, scratch_operands = 0 : i64, tpu.core_type = #tpu.core_type<tc>, window_params = [{transform_indices = @transform_0, window_bounds = array<i64: 16, 128>}, {pipeline_mode = #tpu.pipeline_mode<synchronous>, transform_indices = @transform_1, window_bounds = array<i64: 128, 128>}, {pipeline_mode = #tpu.pipeline_mode<synchronous>, transform_indices = @transform_2, window_bounds = array<i64: 1, 128>}, {transform_indices = @transform_3, window_bounds = array<i64: 16, 128>}]} {
    %c0 = arith.constant 0 : index
    %c0_0 = arith.constant 0 : index
    %0 = vector.load %arg1[%c0, %c0_0] : memref<16x128xf32, #tpu.memory_space<vmem>>, vector<16x128xf32>
    %1 = arith.truncf %0 : vector<16x128xf32> to vector<16x128xbf16>
    %c0_1 = arith.constant 0 : index
    %c0_2 = arith.constant 0 : index
    %2 = vector.load %arg2[%c0_1, %c0_2] : memref<128x128xbf16, #tpu.memory_space<vmem>>, vector<128x128xbf16>
    %cst = arith.constant dense<0.000000e+00> : vector<16x128xf32>
    %3 = tpu.matmul %1, %2, %cst {dimension_numbers = #tpu.dot_dimension_numbers<[1], [0], [0], [1], [0, 0, 1, 1], [], []>} : vector<16x128xbf16>, vector<128x128xbf16>, vector<16x128xf32> -> vector<16x128xf32>
    %c0_3 = arith.constant 0 : index
    %c0_4 = arith.constant 0 : index
    %4 = vector.load %arg3[%c0_3, %c0_4] : memref<1x128xf32, #tpu.memory_space<vmem>>, vector<1x128xf32>
    %5 = vector.broadcast %4 : vector<1x128xf32> to vector<16x128xf32>
    %6 = arith.addf %3, %5 : vector<16x128xf32>
    %7 = arith.addf %6, %0 : vector<16x128xf32>
    %c0_5 = arith.constant 0 : index
    %c0_6 = arith.constant 0 : index
    %8 = vector.load %arg4[%c0_5, %c0_6] : memref<16x128xf32, #tpu.memory_space<vmem>>, vector<16x128xf32>
    tpu.vector_store %arg4[%c0_5, %c0_6], %7 {strides = array<i32>} : memref<16x128xf32, #tpu.memory_space<vmem>>, vector<16x128xf32>,
    return
  }
  func.func @transform_0(%arg0: i32) -> (i32, i32) {
    %c0_i32 = arith.constant 0 : i32
    %c0_i32_0 = arith.constant 0 : i32
    return %arg0, %c0_i32 : i32, i32
  }
  func.func @transform_1(%arg0: i32) -> (i32, i32) {
    %c0_i32 = arith.constant 0 : i32
    %c0_i32_0 = arith.constant 0 : i32
    %c0_i32_1 = arith.constant 0 : i32
    return %c0_i32, %c0_i32_0 : i32, i32
  }
  func.func @transform_2(%arg0: i32) -> (i32, i32) {
    %c0_i32 = arith.constant 0 : i32
    %c0_i32_0 = arith.constant 0 : i32
    %c0_i32_1 = arith.constant 0 : i32
    return %c0_i32, %c0_i32_0 : i32, i32
  }
  func.func @transform_3(%arg0: i32) -> (i32, i32) {
    %c0_i32 = arith.constant 0 : i32
    %c0_i32_0 = arith.constant 0 : i32
    return %arg0, %c0_i32 : i32, i32
  }
}

</mosaic_0001>

<bundles_post_ra>
// kernel: residual.1
= control target key start
LH: loop header
LB: loop body
LE: loop exit
PB: predicated region body
PF: predicated region fallthrough
CT: control target
= control target key end

     0   :  { %v226_v1 = vmov 0.0   ;;  %vm227_vm0 = vmmov 0   ;;  %s296_s0 = inlined_call_operand.vmem [shape: f32[16,128], index: 0, kind: input, shape index: {}]   ;;  %s297_s1 = inlined_call_operand.vmem [shape: bf16[128,128], index: 1, kind: input, shape index: {}]   ;;  %s298_s2 = inlined_call_operand.vmem [shape: f32[1,128], index: 2, kind: input, shape index: {}]   ;;  %s299_s3 = inlined_call_operand.hbm [shape: f32[16,128], index: 3, kind: output, shape index: {}]  }
   0x1   :  { %v194_v0 = vld [vmem:[%s297_s1] sm:$0xff]   ;;  %169 = vmatprep.subr.bf16.mxu0 %v226_v1  ;;  %v195_v2 = vld [vmem:[%s297_s1 + $0x8] sm:$0xff]   ;;  %185 = vmatprep.mubr.msk.bf16.mxu0 %vm227_vm0, %v226_v1  ;;  %v196_v3 = vld [vmem:[%s297_s1 + $0x10] sm:$0xff]  }
   0x2   :  { %170 = vmatpush3.bf16.msra.mxu0 %v194_v0 }
   0x3   :  { %171 = vmatprep.subr.bf16.mxu0 %v226_v1 }
   0x6   :  { %172 = vmatpush3.bf16.msra.mxu0 %v195_v2 }
   0x7   :  { %173 = vmatprep.subr.bf16.mxu0 %v226_v1 }
   0x8   :  { %8 = vsyncpa [#allocation3], 0  ;;  %v197_v4 = vld [vmem:[%s297_s1 + $0x18] sm:$0xff]   ;;  %v198_v5 = vld [vmem:[%s297_s1 + $0x20] sm:$0xff]  }
   0x9   :  { %v199_v6 = vld [vmem:[%s297_s1 + $0x28] sm:$0xff]   ;;  %v200_v7 = vld [vmem:[%s297_s1 + $0x30] sm:$0xff]   ;;  %v201_v8 = vld [vmem:[%s297_s1 + $0x38] sm:$0xff]   ;;  %s228_s1 = smov [#allocation2]  }
   0xa   :  { %174 = vmatpush3.bf16.msra.mxu0 %v196_v3  ;;  %v16_v9 = vld [vmem:[%s296_s0] sm:$0xff]  ;;  %v17_v10 = vld [vmem:[%s296_s0 + $0x8] sm:$0xff]  ;;  %s140_s7 = sshll.u32 %s228_s1, 4  ;;  %s141_s7 = int_to_ptr.vmem [resolvable:$true] %s140_s7 }
   0xb   :  { %175 = vmatprep.subr.bf16.mxu0 %v226_v1  ;;  %v18_v11 = vpack.c.bf16 %v17_v10, %v16_v9  ;;  %v151_v12 = vld [vmem:[%s298_s2] ss:$0 sm:$0xff]  ;;  %s202_s0 = scalar_lea.vmem %s141_s7, 256  ;;  %p207_p1 = scmp.lt.s32.totalorder %s141_s7, %s141_s7 }
   0xc   :  { %p203_p0 = scmp.ne.s32.totalorder %s141_s7, %s202_s0  ;;  %p208_p2 = scmp.lt.s32.totalorder %s202_s0, %s202_s0 }
   0xe   :  { %176 = vmatpush3.bf16.msra.mxu0 %v197_v4  ;;  %p209_p3 = por %p208_p2, %p207_p1 }
   0xf   :  { %177 = vmatprep.subr.bf16.mxu0 %v226_v1 }
  0x10   :  { %p210_p4 = pnand %p209_p3, %p203_p0 }
  0x12   :  { %178 = vmatpush3.bf16.msra.mxu0 %v198_v5 }
  0x13   :  { %179 = vmatprep.subr.bf16.mxu0 %v226_v1 }
  0x16   :  { %180 = vmatpush3.bf16.msra.mxu0 %v199_v6 }
  0x17   :  { %181 = vmatprep.subr.bf16.mxu0 %v226_v1 }
  0x1a   :  { %182 = vmatpush3.bf16.msra.mxu0 %v200_v7 }
  0x1b   :  { %183 = vmatprep.subr.bf16.mxu0 %v226_v1 }
  0x1e   :  { %184 = vmatpush3.bf16.msra.mxu0 %v201_v8 }
  0x21   :  { %186 = vmatmul.mubr.bf16.vlgmr.msra.gmra.mrb[0].mxu0 %v18_v11 }
  0xf4   :  { %v124_v13 = vpop.f32.mrb[0].mxu0 }
  0xf5   :  { %v125_v14 = vadd.f32 %v151_v12, %v124_v13  ;;  %v187_v15 = vpop.f32.mrb[1].mxu0 }
  0xf6   :  { %v127_v16 = vpop.f32.mrb[2].mxu0 }
  0xf7   :  { %v131_v17 = vadd.f32 %v125_v14, %v16_v9  ;;  %v128_v18 = vadd.f32 %v151_v12, %v127_v16  ;;  %v188_v19 = vpop.f32.mrb[3].mxu0 }
  0xf9   :  { %133 = vst [vmem:[#allocation2] sm:$0xff] %v131_v17  ;;  %v132_v20 = vadd.f32 %v128_v18, %v17_v10 }
  0xfb   :  { %134 = vst [vmem:[#allocation2 + $0x8] sm:$0xff] %v132_v20 }
  0xfc   :  { %213 = shalt.err (!%p210_p4)
}
  0xfd   :  { %s214_s9 = scalar_lea.hbm %s299_s3, 256 }
  0xfe   :  { %p215_p5 = scmp.ne.s32.totalorder %s299_s3, %s214_s9  ;;  %p218_p6 = scmp.lt.u32.totalorder %s214_s9, %s299_s3 }
 0x100   :  { %p220_p7 = pnand %p218_p6, %p215_p5 }
 0x102   :  { %223 = shalt.err (!%p220_p7)
}
 0x103   :  { %s229_s14 = smov 128   ;;  %s230_s15 = smov 8  }
 0x104   :  { %146 = dma.vmem_to_hbm [thread:$0]  %s141_s7, 256, %s299_s3, [#allocation3], %s229_s14, %s229_s14, %s230_s15  }
 0x105   :  { %224 = dma.done.wait [#allocation3], 256  }
 0x106   :  { %225 = vsyncadd [#allocation3], 4294967040 }
 0x107   :  { %150 = vsyncpa [#allocation3], 1 }

</bundles_post_ra>
